<compile_context>
chip_gen: v5e
topology: v5e:2x2
jax: 0.10.0
libtpu: 0.0.40
codegen_flags: <defaults>
</compile_context>

<pallas_src>
import functools
import math

import jax
import jax.numpy as jnp
from jax import lax
from jax.experimental import pallas as pl
from jax.experimental.pallas import tpu as pltpu


def head_kernel(x_ref, w_ref, o_ref, *, block_b, seq_len, head_size,
                approx_recip):
    # x_ref: (block_b*T, C)   compute dtype (bf16 fast path / f32 exact path)
    # w_ref: (C, 3H)          compute dtype, columns ordered [key | query | value]
    # o_ref: (block_b, T*H)   caller dtype, lane-dense output slab
    Bb, T, H = block_b, seq_len, head_size

    # --- Fused QKV projection: one MXU matmul, f32 accumulation. -------------
    proj = jnp.dot(x_ref[...], w_ref[...],
                   preferred_element_type=jnp.float32)          # (Bb*T, 3H)

    k = proj[:, 0 * H:1 * H]
    # Fold the 1/sqrt(H) softmax scale into q (Bb*T*H mults, not Bb*T*T).
    q = proj[:, 1 * H:2 * H] * jnp.float32(1.0 / math.sqrt(H))
    v = proj[:, 2 * H:3 * H]

    kb = k.reshape(Bb, T, H)
    qb = q.reshape(Bb, T, H)
    vb = v.reshape(Bb, T, H)

    # --- Attention, entirely in f32 (K=H tiny; bf16 buys no MXU throughput). -
    scores = jnp.einsum("bqh,bkh->bqk", qb, kb,
                        preferred_element_type=jnp.float32)     # (Bb, T, T)

    # Causal mask with a large finite negative (no inf-inf -> NaN hazard).
    row = lax.broadcasted_iota(jnp.int32, (T, T), 0)
    col = lax.broadcasted_iota(jnp.int32, (T, T), 1)
    scores = jnp.where((col <= row)[None, :, :], scores, jnp.float32(-1e30))

    # Softmax over the key axis, in f32.
    m = jnp.max(scores, axis=-1, keepdims=True)
    e = jnp.exp(scores - m)
    denom = jnp.sum(e, axis=-1, keepdims=True)
    # approx=True -> EUP vrcp (free slot); only taken on the bf16 fast path.
    wei = e * pl.reciprocal(denom, approx=approx_recip)

    # Dropout(p=0.0) == identity.

    out = jnp.einsum("bqk,bkh->bqh", wei, vb,
                     preferred_element_type=jnp.float32)        # (Bb, T, H)

    # Lane-dense store: last dim is T*H instead of H (avoids masked vst.msk).
    o_ref[...] = out.reshape(Bb, T * H).astype(o_ref.dtype)


def _pick_block_b(B, T, target_rows=1024, min_rows=256):
    """Pick how many batch elements each grid step handles.

    Partial blocks must keep second-minor BlockSpec dims tile-aligned: the x
    block is (block_b*T, C) and the output block is (block_b, T*H), so a
    partial block needs block_b % 16 == 0 (covers f32 (8,128) and bf16 (16,128)
    sublane packing).  block_b == B (block == full array) is always legal.
    """
    legal = [bb for bb in range(1, B + 1)
             if B % bb == 0 and (bb == B or bb % 16 == 0)]
    # Prefer >= 2 grid steps (v7x: 2 TensorCores) while keeping each step above
    # min_rows of matmul work; otherwise maximize rows per step (<= target).
    multi = [bb for bb in legal if bb < B and min_rows <= bb * T <= target_rows]
    if multi:
        return max(multi)
    under = [bb for bb in legal if bb * T <= target_rows]
    if under:
        return max(under)
    return min(legal)


def head_forward(x, w_key, w_query, w_value, *, block_b=None,
                 compute_dtype=jnp.bfloat16, approx_recip=None):
    """One causal self-attention head (dropout=0).

    x: (B, T, C); w_*: PyTorch-style (H, C) nn.Linear weights (bias=False).
    """
    B, T, C = x.shape
    H = w_key.shape[0]
    out_dtype = x.dtype
    if approx_recip is None:
        # Exact reciprocal on the all-f32 path; EUP vrcp on the bf16 fast path.
        approx_recip = compute_dtype != jnp.float32

    if block_b is None:
        block_b = _pick_block_b(B, T)
    assert B % block_b == 0 and (block_b == B or block_b % 16 == 0), block_b
    grid = (B // block_b,)

    # Collapse (B, T) onto the matmul M axis (free contiguous view); fuse and
    # pre-transpose the three projection weights into one (C, 3H) RHS.
    x2 = x.reshape(B * T, C).astype(compute_dtype)
    w_qkv = jnp.concatenate([w_key, w_query, w_value], axis=0).T    # (C, 3H)
    w_qkv = w_qkv.astype(compute_dtype)

    kernel = functools.partial(head_kernel, block_b=block_b, seq_len=T,
                               head_size=H, approx_recip=approx_recip)

    # VMEM budget: double-buffered input/weight/output blocks plus in-kernel
    # f32 intermediates (projection, k/q/v, scores/exp/wei, attention output).
    cbytes = jnp.dtype(compute_dtype).itemsize
    obytes = jnp.dtype(out_dtype).itemsize
    rows = block_b * T
    vmem_bytes = (2 * rows * C * cbytes            # x blocks (double-buffered)
                  + 2 * C * 3 * H * cbytes         # fused weight
                  + 2 * block_b * T * H * obytes   # output blocks
                  + rows * 3 * H * 4               # fused projection (f32)
                  + 3 * rows * H * 4               # k, q, v
                  + 4 * block_b * T * T * 4        # scores / mask / exp / wei
                  + rows * H * 4)                  # attention output
    vmem_limit = int(min(max(2 * vmem_bytes + (1 << 20), 32 << 20), 64 << 20))

    flops = 2 * B * T * C * 3 * H + 2 * 2 * B * T * T * H
    bytes_accessed = (x2.size * x2.dtype.itemsize
                      + w_qkv.size * w_qkv.dtype.itemsize
                      + B * T * H * obytes)
    cost = pl.CostEstimate(flops=flops, transcendentals=B * T * T,
                           bytes_accessed=bytes_accessed)

    out2 = pl.pallas_call(
        kernel,
        out_shape=jax.ShapeDtypeStruct((B, T * H), out_dtype),
        grid_spec=pltpu.PrefetchScalarGridSpec(
            num_scalar_prefetch=0,
            grid=grid,
            in_specs=[
                pl.BlockSpec((block_b * T, C), lambda i: (i, 0)),
                pl.BlockSpec((C, 3 * H), lambda i: (0, 0)),
            ],
            out_specs=pl.BlockSpec((block_b, T * H), lambda i: (i, 0)),
        ),
        compiler_params=pltpu.CompilerParams(
            dimension_semantics=("parallel",),
            vmem_limit_bytes=vmem_limit),
        cost_estimate=cost,
    )(x2, w_qkv)

    return out2.reshape(B, T, H)


def head_reference(x, w_key, w_query, w_value):
    """Pure-JAX reference mirroring the PyTorch forward (dropout=0)."""
    B, T, C = x.shape
    k = x @ w_key.T
    q = x @ w_query.T
    v = x @ w_value.T
    wei = (q @ jnp.swapaxes(k, -2, -1)) * (k.shape[-1] ** -0.5)
    tril = jnp.tril(jnp.ones((T, T), dtype=bool))
    wei = jnp.where(tril[None, :, :], wei, -jnp.inf)
    wei = jax.nn.softmax(wei, axis=-1)
    return wei @ v


if __name__ == "__main__":
    # Small config: n_embd=32, n_head=4 -> head_size=8, block_size=T=8, B=2.
    B, T, C = 2, 8, 32
    n_head = 4
    H = C // n_head  # head_size = 8

    key = jax.random.PRNGKey(0)
    kx, kk, kq, kv = jax.random.split(key, 4)

    x = jax.random.normal(kx, (B, T, C), dtype=jnp.float32)
    # nn.Linear(C, H, bias=False) weights have shape (H, C).
    bound = 1.0 / math.sqrt(C)
    w_key = jax.random.uniform(kk, (H, C), jnp.float32, -bound, bound)
    w_query = jax.random.uniform(kq, (H, C), jnp.float32, -bound, bound)
    w_value = jax.random.uniform(kv, (H, C), jnp.float32, -bound, bound)

    ref = head_reference(x, w_key, w_query, w_value)

    # Exact path: all-f32 compute, exact reciprocal.
    out_f32 = jax.block_until_ready(
        head_forward(x, w_key, w_query, w_value, compute_dtype=jnp.float32))
    assert out_f32.shape == (B, T, H), out_f32.shape
    assert jnp.allclose(out_f32, ref, atol=1e-4, rtol=1e-4), (
        float(jnp.max(jnp.abs(out_f32 - ref))))

    # Fast path: bf16 projection inputs, f32 accumulation + f32 attention math.
    out_bf16 = jax.block_until_ready(head_forward(x, w_key, w_query, w_value))
    assert out_bf16.shape == (B, T, H), out_bf16.shape
    assert jnp.allclose(out_bf16, ref, atol=2e-2, rtol=2e-2), (
        float(jnp.max(jnp.abs(out_bf16 - ref))))

    print("KERNEL_OK")
</pallas_src>

<mosaic_0001>
module attributes {stable_mosaic.version = 11 : i64} {
  func.func @head_kernel(%arg0: i32, %arg1: memref<16x32xf32, #tpu.memory_space<vmem>>, %arg2: memref<32x24xf32, #tpu.memory_space<vmem>>, %arg3: memref<2x64xf32, #tpu.memory_space<vmem>>) attributes {dimension_semantics = [#tpu.dimension_semantics<parallel>], iteration_bounds = array<i64: 1>, scalar_prefetch = 0 : i64, scratch_operands = 0 : i64, tpu.core_type = #tpu.core_type<tc>, window_params = [{transform_indices = @transform_0, window_bounds = array<i64: 16, 32>}, {pipeline_mode = #tpu.pipeline_mode<synchronous>, transform_indices = @transform_1, window_bounds = array<i64: 32, 24>}, {transform_indices = @transform_2, window_bounds = array<i64: 2, 64>}]} {
    %c0 = arith.constant 0 : index
    %c0_0 = arith.constant 0 : index
    %0 = vector.load %arg1[%c0, %c0_0] : memref<16x32xf32, #tpu.memory_space<vmem>>, vector<16x32xf32>
    %c0_1 = arith.constant 0 : index
    %c0_2 = arith.constant 0 : index
    %1 = vector.load %arg2[%c0_1, %c0_2] : memref<32x24xf32, #tpu.memory_space<vmem>>, vector<32x24xf32>
    %cst = arith.constant dense<0.000000e+00> : vector<16x24xf32>
    %2 = tpu.matmul %0, %1, %cst {dimension_numbers = #tpu.dot_dimension_numbers<[1], [0], [0], [1], [0, 0, 1, 1], [], []>} : vector<16x32xf32>, vector<32x24xf32>, vector<16x24xf32> -> vector<16x24xf32>
    %3 = vector.extract_strided_slice %2 {offsets = [0, 0], sizes = [16, 8], strides = [1, 1]} : vector<16x24xf32> to vector<16x8xf32>
    %4 = vector.extract_strided_slice %2 {offsets = [0, 8], sizes = [16, 8], strides = [1, 1]} : vector<16x24xf32> to vector<16x8xf32>
    %cst_3 = arith.constant 0.353553385 : f32
    %5 = vector.broadcast %cst_3 : f32 to vector<16x8xf32>
    %6 = arith.mulf %4, %5 : vector<16x8xf32>
    %7 = vector.extract_strided_slice %2 {offsets = [0, 16], sizes = [16, 8], strides = [1, 1]} : vector<16x24xf32> to vector<16x8xf32>
    %8 = vector.shape_cast %3 : vector<16x8xf32> to vector<2x8x8xf32>
    %9 = vector.shape_cast %6 : vector<16x8xf32> to vector<2x8x8xf32>
    %10 = vector.shape_cast %7 : vector<16x8xf32> to vector<2x8x8xf32>
    "tpu.trace_start"() <{level = 10 : i32, message = "bqh,bkh->bqk"}> : () -> ()
    %cst_4 = arith.constant dense<0.000000e+00> : vector<2x8x8xf32>
    %11 = tpu.matmul %9, %8, %cst_4 {dimension_numbers = #tpu.dot_dimension_numbers<[2], [2], [1], [1], [0, 0, 0, 1, 1, 1], [0], [0]>} : vector<2x8x8xf32>, vector<2x8x8xf32>, vector<2x8x8xf32> -> vector<2x8x8xf32>
    "tpu.trace_stop"() : () -> ()
    %12 = tpu.iota {dimensions = array<i32: 0>} : vector<8x8xi32>
    %13 = tpu.iota {dimensions = array<i32: 1>} : vector<8x8xi32>
    %14 = arith.cmpi sle, %13, %12 : vector<8x8xi32>
    %15 = vector.shape_cast %14 : vector<8x8xi1> to vector<1x8x8xi1>
    %cst_5 = arith.constant -1.000000e+30 : f32
    %16 = vector.shape_cast %15 : vector<1x8x8xi1> to vector<1x8x8xi1>
    %17 = vector.broadcast %16 : vector<1x8x8xi1> to vector<2x8x8xi1>
    %18 = vector.broadcast %cst_5 : f32 to vector<2x8x8xf32>
    %19 = arith.select %17, %11, %18 : vector<2x8x8xi1>, vector<2x8x8xf32>
    %cst_6 = arith.constant dense<0xFF800000> : vector<2x8xf32>
    %20 = vector.multi_reduction <maximumf>, %19, %cst_6 [2] : vector<2x8x8xf32> to vector<2x8xf32>
    %21 = vector.shape_cast %20 : vector<2x8xf32> to vector<2x8x1xf32>
    %22 = vector.broadcast %21 : vector<2x8x1xf32> to vector<2x8x8xf32>
    %23 = arith.subf %19, %22 : vector<2x8x8xf32>
    %24 = math.exp %23 : vector<2x8x8xf32>
    %cst_7 = arith.constant dense<0.000000e+00> : vector<2x8xf32>
    %25 = vector.multi_reduction <add>, %24, %cst_7 [2] : vector<2x8x8xf32> to vector<2x8xf32>
    %26 = vector.shape_cast %25 : vector<2x8xf32> to vector<2x8x1xf32>
    %27 = tpu.reciprocal %26 : vector<2x8x1xf32> -> vector<2x8x1xf32>
    %28 = vector.broadcast %27 : vector<2x8x1xf32> to vector<2x8x8xf32>
    %29 = arith.mulf %24, %28 : vector<2x8x8xf32>
    "tpu.trace_start"() <{level = 10 : i32, message = "bqk,bkh->bqh"}> : () -> ()
    %cst_8 = arith.constant dense<0.000000e+00> : vector<2x8x8xf32>
    %30 = tpu.matmul %29, %10, %cst_8 {dimension_numbers = #tpu.dot_dimension_numbers<[2], [1], [1], [2], [0, 0, 0, 1, 1, 2], [0], [0]>} : vector<2x8x8xf32>, vector<2x8x8xf32>, vector<2x8x8xf32> -> vector<2x8x8xf32>
    "tpu.trace_stop"() : () -> ()
    %31 = vector.shape_cast %30 : vector<2x8x8xf32> to vector<2x64xf32>
    %c0_9 = arith.constant 0 : index
    %c0_10 = arith.constant 0 : index
    %32 = vector.load %arg3[%c0_9, %c0_10] : memref<2x64xf32, #tpu.memory_space<vmem>>, vector<2x64xf32>
    tpu.vector_store %arg3[%c0_9, %c0_10], %31 {strides = array<i32>} : memref<2x64xf32, #tpu.memory_space<vmem>>, vector<2x64xf32>,
    return
  }
  func.func @transform_0(%arg0: i32) -> (i32, i32) {
    %c0_i32 = arith.constant 0 : i32
    %c0_i32_0 = arith.constant 0 : i32
    return %arg0, %c0_i32 : i32, i32
  }
  func.func @transform_1(%arg0: i32) -> (i32, i32) {
    %c0_i32 = arith.constant 0 : i32
    %c0_i32_0 = arith.constant 0 : i32
    %c0_i32_1 = arith.constant 0 : i32
    return %c0_i32, %c0_i32_0 : i32, i32
  }
  func.func @transform_2(%arg0: i32) -> (i32, i32) {
    %c0_i32 = arith.constant 0 : i32
    %c0_i32_0 = arith.constant 0 : i32
    return %arg0, %c0_i32 : i32, i32
  }
}

</mosaic_0001>

<bundles_post_ra>
// kernel: tpu_custom_call.1
= control target key start
LH: loop header
LB: loop body
LE: loop exit
PB: predicated region body
PF: predicated region fallthrough
CT: control target
= control target key end

     0   :  { %s453_s0 = inlined_call_operand.vmem [shape: f32[16,32], index: 0, kind: input, shape index: {}]   ;;  %s454_s1 = inlined_call_operand.vmem [shape: f32[32,24], index: 1, kind: input, shape index: {}]   ;;  %s455_s2 = inlined_call_operand.hbm [shape: f32[2,64], index: 2, kind: output, shape index: {}]  }
   0x1   :  { %v17_v0 = vld [vmem:[%s454_s1 + $0x18] sm:$0xff]  ;;  %v16_v1 = vld [vmem:[%s454_s1 + $0x10] sm:$0xff]  ;;  %v15_v2 = vld [vmem:[%s454_s1 + $0x8] sm:$0xff] }
   0x2   :  { %37 = vmatpush.msra.mxu0 %v17_v0 }
   0x3   :  { %7 = vsyncpa [#allocation3], 0  ;;  %v14_v3 = vld [vmem:[%s454_s1] sm:$0xff]  ;;  %vm18_vm0 = vcmask 261120   ;;  %v13_v5 = vld [vmem:[%s453_s0 + $0x8] sm:$0xff]  ;;  %vm53_vm1 = vcmask 64512   ;;  %v107_v13 = vlaneseq }
   0x4   :  { %38 = vmatpush.msra.mxu0 %v16_v1  ;;  %v12_v4 = vld [vmem:[%s453_s0] sm:$0xff]  ;;  %s381_s1 = smov 120   ;;  %s382_s21 = smov 112   ;;  %v383_v57 = vmov 1983009808   ;;  %vm217_vm11 = vcmask 1047556  }
   0x5   :  { %v108_v14 = vshrl.u32 %v107_v13, 7  ;;  %v110_v15 = vand.u32 127, %v107_v13  ;;  %v220_v58 = vunpack.c.l.s4 %v383_v57  ;;  %v384_v62 = vmov 1934713408   ;;  %s385_s0 = smov 16   ;;  %s386_s22 = smov 48  }
   0x6   :  { %39 = vmatpush.msra.mxu0 %v15_v2  ;;  %v242_v63 = vunpack.c.l.s4 %v384_v62  ;;  %s387_s23 = smov 8   ;;  %s388_s24 = smov 24   ;;  %vm298_vm12 = vcmask 130048   ;;  %vm300_vm13 = vcmask 195584   ;;  %vm303_vm14 = vcmask 326656  }
   0x7   :  { %vm111_vm2 = vcmp.le.s32.totalorder %v110_v15, %v108_v14  ;;  %v221_v61 = vunpack.c.0.s8 %v220_v58  ;;  %s389_s25 = smov 40   ;;  %s390_s26 = smov 32   ;;  %vm305_vm15 = vcmask 392192  }
   0x8   :  { %40 = vmatpush.msra.mxu0 %v14_v3  ;;  %s391_s27 = smov 56   ;;  %s392_s28 = smov [#allocation2]  }
   0x9   :  { %327 = vmatmul.msk.f32.vlgmr.msra.gmra.mxu0 %vm18_vm0, %v12_v4  ;;  %v243_v4 = vunpack.c.0.s8 %v242_v63  ;;  %s316_s29 = sshll.u32 %s392_s28, 4  ;;  %s318_s4 = sshll.u32 %s455_s2, 4  ;;  %s317_s29 = int_to_ptr.vmem [resolvable:$true] %s316_s29  ;;  %s319_s4 = int_to_ptr.hbm [resolvable:$true] %s318_s4 }
  0x11   :  { %328 = vmatmul.msk.f32.gmra.mxu0 %vm18_vm0, %v13_v5 }
  0x86   :  { %v42_v6 = vpop.f32.mrf.mxu0 }
  0x87   :  { %329 = vmatpush.xpose.msk.msra.mxu1 %vm53_vm1, %v42_v6  ;;  %v48_v7 = vmul.f32 0.35355338, %v42_v6 }
  0x89   :  { %51 = vrot.lane.b32.xlu0 %v48_v7, %s381_s1 }
  0x8e   :  { %v45_v8 = vpop.f32.mrf.mxu0 }
  0x8f   :  { %v49_v9 = vmul.f32 0.35355338, %v45_v8  ;;  %331 = vmatpush.xpose.msk.msra.mxu2 %vm53_vm1, %v45_v8 }
  0x91   :  { %80 = vrot.lane.b32.xlu0 %v49_v9, %s381_s1 }
  0x99   :  { %164 = vrot.lane.b32.xlu0 %v42_v6, %s382_s21 }
  0xfb   :  { %v52_v10 = vpop.permute.xlu0 %51 }
  0xfc   :  { %330 = vmatmul.msk.f32.vlgmr.msra.gmra.mxu1 %vm53_vm1, %v52_v10 }
 0x103   :  { %v81_v11 = vpop.permute.xlu0 %80 }
 0x104   :  { %332 = vmatmul.msk.f32.vlgmr.msra.gmra.mxu2 %vm53_vm1, %v81_v11 }
 0x10b   :  { %v165_v12 = vpop.permute.xlu0 %164 }
 0x10c   :  { %185 = vmatpush.msra.mxu3 %v165_v12 }
 0x179   :  { %v76_v16 = vpop.f32.mrf.mxu1 }
 0x17a   :  { %v114_v17 = vsel %vm111_vm2, %v76_v16, -1e+30 }
 0x17b   :  { %v116_v18 = vsel %vm53_vm1, %v114_v17, -inf }
 0x17c   :  { %117 = vmax.xlane.f32.xlu1 %v116_v18 }
 0x187   :  { %v104_v19 = vpop.f32.mrf.mxu2 }
 0x188   :  { %v115_v20 = vsel %vm111_vm2, %v104_v19, -1e+30  ;;  %vm307_vm2 = vcmask 457728  }
 0x189   :  { %v119_v21 = vsel %vm53_vm1, %v115_v20, -inf }
 0x18a   :  { %120 = vmax.xlane.f32.xlu1 %v119_v21 }
 0x1a3   :  { %190 = vrot.lane.b32.xlu1 %v45_v8, %s382_s21 }
 0x1ef   :  { %v118_v22 = vpop.xlane.xlu1 %117 }
 0x1f0   :  { %v122_v23 = vsub.f32 %v114_v17, %v118_v22 }
 0x1f2   :  { %v124_v24 = vmul.f32 1.442695, %v122_v23 }
 0x1f4   :  { %347 = vpow2.f32 %v124_v24 }
 0x1fa   :  { %v348_v25 = vpop.eup %347 }
 0x1fb   :  { %v128_v26 = vsel %vm53_vm1, %v348_v25, 0.0 }
 0x1fc   :  { %129 = vadd.xlane.f32.xlu2 %v128_v26 }
 0x1fd   :  { %v121_v27 = vpop.xlane.xlu1 %120 }
 0x1fe   :  { %v123_v28 = vsub.f32 %v115_v20, %v121_v27 }
 0x200   :  { %v126_v29 = vmul.f32 1.442695, %v123_v28 }
 0x202   :  { %349 = vpow2.f32 %v126_v29 }
 0x208   :  { %v350_v30 = vpop.eup %349 }
 0x209   :  { %v131_v31 = vsel %vm53_vm1, %v350_v30, 0.0 }
 0x20a   :  { %132 = vadd.xlane.f32.xlu2 %v131_v31 }
 0x215   :  { %v191_v32 = vpop.permute.xlu1 %190 }
 0x216   :  { %211 = vmatpush.msrb.mxu3 %v191_v32 }
 0x26f   :  { %v130_v33 = vpop.xlane.xlu2 %129 }
 0x270   :  { %351 = vrcp.f32 %v130_v33  ;;  %v145_v37 = vand.u32 2147483648, %v130_v33  ;;  %v143_v39 = vand.u32 2147483647, %v130_v33  ;;  %vm139_vm4 = vweird.f32 %v130_v33 }
 0x272   :  { %v146_v42 = vor.u32 1.1754944e-38, %v145_v37  ;;  %vm144_vm6 = vcmp.eq.f32.partialorder %v143_v39, 8.507059e+37 }
 0x276   :  { %v352_v34 = vpop.eup %351 }
 0x277   :  { %v135_v35 = vmul.f32 %v352_v34, %v130_v33  ;;  %vm140_vm3 = vweird.f32 %v352_v34 }
 0x278   :  { %vm141_vm5 = vmor %vm139_vm4, %vm140_vm3  ;;  %vm309_vm3 = vcmask 517120  }
 0x279   :  { %v136_v36 = vsub.f32 1.0, %v135_v35 }
 0x27b   :  { %v137_v38 = vmul.f32 %v352_v34, %v136_v36 }
 0x27d   :  { %v133_v40 = vpop.xlane.xlu2 %132  ;;  %v138_v41 = vadd.f32 %v352_v34, %v137_v38 }
 0x27e   :  { %353 = vrcp.f32 %v133_v40  ;;  %v159_v49 = vand.u32 2147483648, %v133_v40  ;;  %v157_v51 = vand.u32 2147483647, %v133_v40  ;;  %vm153_vm8 = vweird.f32 %v133_v40 }
 0x27f   :  { %v142_v43 = vsel %vm141_vm5, %v352_v34, %v138_v41 }
 0x280   :  { %v147_v44 = vsel %vm144_vm6, %v146_v42, %v142_v43  ;;  %v160_v53 = vor.u32 1.1754944e-38, %v159_v49  ;;  %vm158_vm10 = vcmp.eq.f32.partialorder %v157_v51, 8.507059e+37 }
 0x281   :  { %v162_v45 = vmul.f32 %v348_v25, %v147_v44 }
 0x283   :  { %333 = vmatmul.msk.f32.vlgmr.msra.gmra.mxu3 %vm53_vm1, %v162_v45 }
 0x284   :  { %v354_v46 = vpop.eup %353 }
 0x285   :  { %v149_v47 = vmul.f32 %v354_v46, %v133_v40  ;;  %vm154_vm7 = vweird.f32 %v354_v46 }
 0x286   :  { %vm155_vm9 = vmor %vm153_vm8, %vm154_vm7 }
 0x287   :  { %v150_v48 = vsub.f32 1.0, %v149_v47 }
 0x289   :  { %v151_v50 = vmul.f32 %v354_v46, %v150_v48 }
 0x28b   :  { %v152_v52 = vadd.f32 %v354_v46, %v151_v50 }
 0x28d   :  { %v156_v54 = vsel %vm155_vm9, %v354_v46, %v152_v52 }
 0x28e   :  { %v161_v55 = vsel %vm158_vm10, %v160_v53, %v156_v54 }
 0x28f   :  { %v163_v56 = vmul.f32 %v350_v30, %v161_v55 }
 0x291   :  { %334 = vmatmul.msk.f32.vlgmr.msrb.gmra.mxu3 %vm53_vm1, %v163_v56 }
 0x306   :  { %v187_v59 = vpop.f32.mrf.mxu3 }
 0x307   :  { %v216_v60 = vrot.slane %v187_v59, 4  ;;  %v222_v1 = vperm.slane %v187_v59, %v221_v61 }
 0x309   :  { %v218_v0 = vsel %vm217_vm11, 0.0, %v216_v60  ;;  %v239_v5 = vrot.slane %v222_v1, 4 }
 0x30a   :  { %v226_v2 = vperm.slane %v218_v0, %v221_v61 }
 0x30c   :  { %v251_v11 = vrot.slane %v226_v2, 4 }
 0x314   :  { %v213_v3 = vpop.f32.mrf.mxu3 }
 0x315   :  { %v227_v6 = vrot.slane %v213_v3, 4  ;;  %v232_v7 = vperm.slane %v213_v3, %v221_v61 }
 0x317   :  { %v228_v8 = vsel %vm217_vm11, 0.0, %v227_v6  ;;  %v237_v9 = vrot.slane %v232_v7, 4  ;;  %v240_v10 = vsel %vm217_vm11, %v232_v7, %v239_v5 }
 0x318   :  { %v236_v12 = vperm.slane %v228_v8, %v221_v61  ;;  %v248_v13 = vperm.slane %v240_v10, %v243_v4 }
 0x319   :  { %v238_v14 = vsel %vm217_vm11, %v237_v9, %v222_v1 }
 0x31a   :  { %v249_v15 = vrot.slane %v236_v12, 4  ;;  %274 = vrot.lane.b32.xlu0 %v248_v13, %s385_s0  ;;  %v252_v16 = vsel %vm217_vm11, %v236_v12, %v251_v11  ;;  %v244_v17 = vperm.slane %v238_v14, %v243_v4  ;;  %v263_v21 = vrot.slane %v248_v13, 4 }
 0x31b   :  { %v260_v18 = vperm.slane %v252_v16, %v243_v4 }
 0x31c   :  { %v261_v19 = vrot.slane %v244_v17, 4  ;;  %v250_v20 = vsel %vm217_vm11, %v249_v15, %v226_v2  ;;  %v264_v24 = vsel %vm217_vm11, 0.0, %v263_v21 }
 0x31d   :  { %290 = vrot.lane.b32.xlu1 %v260_v18, %s386_s22  ;;  %v256_v23 = vperm.slane %v250_v20, %v243_v4  ;;  %v267_v27 = vrot.slane %v260_v18, 4 }
 0x31e   :  { %v262_v22 = vsel %vm217_vm11, 0.0, %v261_v19 }
 0x31f   :  { %270 = vrot.lane.b32.xlu2 %v262_v22, %s387_s23  ;;  %v265_v25 = vrot.slane %v256_v23, 4  ;;  %v268_v28 = vsel %vm217_vm11, 0.0, %v267_v27 }
 0x321   :  { %v266_v26 = vsel %vm217_vm11, 0.0, %v265_v25 }
 0x322   :  { %278 = vrot.lane.b32.xlu0 %v264_v24, %s388_s24 }
 0x327   :  { %286 = vrot.lane.b32.xlu2 %v266_v26, %s389_s25 }
 0x32a   :  { %282 = vrot.lane.b32.xlu0 %v256_v23, %s390_s26 }
 0x332   :  { %294 = vrot.lane.b32.xlu0 %v268_v28, %s391_s27 }
 0x379   :  { %v271_v31 = vpop.permute.xlu2 %270 }
 0x37a   :  { %v297_v32 = vsel %vm53_vm1, %v244_v17, %v271_v31 }
 0x381   :  { %v287_v37 = vpop.permute.xlu2 %286 }
 0x38c   :  { %v275_v29 = vpop.permute.xlu0 %274 }
 0x38d   :  { %v299_v33 = vsel %vm298_vm12, %v297_v32, %v275_v29 }
 0x38f   :  { %v291_v39 = vpop.permute.xlu1 %290 }
 0x394   :  { %v279_v30 = vpop.permute.xlu0 %278 }
 0x395   :  { %v301_v35 = vsel %vm300_vm13, %v299_v33, %v279_v30 }
 0x39c   :  { %v283_v34 = vpop.permute.xlu0 %282 }
 0x39d   :  { %v302_v36 = vsel %vm18_vm0, %v301_v35, %v283_v34 }
 0x39e   :  { %v304_v38 = vsel %vm303_vm14, %v302_v36, %v287_v37 }
 0x39f   :  { %v306_v41 = vsel %vm305_vm15, %v304_v38, %v291_v39 }
 0x3a4   :  { %v295_v40 = vpop.permute.xlu0 %294 }
 0x3a5   :  { %v308_v42 = vsel %vm307_vm2, %v306_v41, %v295_v40 }
 0x3a6   :  { %310 = vst.msk [vmem:[#allocation2] sm:$0x3] %vm309_vm3, %v308_v42 }
 0x3a7   :  { %321 = dma.vmem_to_hbm [thread:$0]  %s317_s29, 32, %s319_s4, [#allocation3]  }
 0x3a8   :  { %379 = dma.done.wait [#allocation3], 32  }
 0x3a9   :  { %380 = vsyncadd [#allocation3], 4294967264 }
 0x3aa   :  { %326 = vsyncpa [#allocation3], 1 }

</bundles_post_ra>
